<compile_context>
chip_gen: v5e
topology: v5e:2x2
jax: 0.10.0
libtpu: 0.0.40
codegen_flags: <defaults>
</compile_context>

<pallas_src>
import functools

import jax
import jax.numpy as jnp
from jax.experimental import pallas as pl
from jax.experimental.pallas import tpu as pltpu


def gsf_kernel(x_ref, w1_ref, b1_ref, w21_ref, b21_ref, disT_ref, o_ref,
               *, bt, c_out, thr_eff):
    """One grid step = `bt` batches, everything T-major.

    x_ref:    (T, bt*C_in)         input, free reshape of (T, bt, C_in)    [f32]
    w1_ref:   (bt*C_in, bt*C_out)  block-diag channel_reduce weight^T      [bf16]
    b1_ref:   (1, bt*C_out)                                                [f32]
    w21_ref:  (bt*C_in, bt*C_out)  block-diag (gcn_conv @ channel_reduce)^T[bf16]
    b21_ref:  (1, bt*C_out)        fused bias                              [f32]
    disT_ref: (T, T)               softmax(exp(-|i-j|/sigma), -1)^T        [bf16]
    o_ref:    (T, bt*C_out)        spikes, (b, c_out) flattened onto lanes [f32]
    """
    x_bf = x_ref[...].astype(jnp.bfloat16)                                  # (T, bt*C_in)

    # Batched 1x1 convs: one MXU matmul per path for ALL bt batches.  The gcn path
    # uses the pre-fused (W2 @ W1), so both matmuls depend only on x.
    red_all = jnp.dot(x_bf, w1_ref[...],
                      preferred_element_type=jnp.float32) + b1_ref[...]     # (T, bt*C_out)
    gcn_all = jnp.dot(x_bf, w21_ref[...],
                      preferred_element_type=jnp.float32) + b21_ref[...]    # (T, bt*C_out)
    gcn_bf = gcn_all.astype(jnp.bfloat16)

    # Batch-independent half of the propagation, distributed through the adjacency
    # add:  dis_part[t, (b,o)] = sum_s softmax(dis)[s, t] * gcn_b[s, o].
    # One shared lane-dense (T,T)@(T, bt*C_out) matmul, already in output layout.
    dis_part = jnp.dot(disT_ref[...], gcn_bf,
                       preferred_element_type=jnp.float32)                  # (T, bt*C_out)

    for b in range(bt):                          # static unroll over the batch tile
        lo, hi = b * c_out, (b + 1) * c_out
        red_b = red_all[:, lo:hi]                                           # (T, C_out)

        # F.normalize(p=2, dim=channels), eps=1e-12  ->  rsqrt(max(ss, 1e-24)).
        ssq = jnp.sum(red_b * red_b, axis=-1, keepdims=True)                # (T, 1)
        n_b = (red_b * jax.lax.rsqrt(jnp.maximum(ssq, 1e-24))).astype(jnp.bfloat16)

        # Cosine-similarity adjacency, softmax over the key axis.  The EXACT softmax
        # denominator is folded into a (T,1) scaling of gcn_b (not a (T,T) divide,
        # not an approx reciprocal):  out[t,o] = sum_s e[s,t] * (gcn_b[s,o]/denom[s]).
        sim = jnp.einsum('tc,sc->ts', n_b, n_b,
                         preferred_element_type=jnp.float32)                # (T, T)
        m = jnp.max(sim, axis=-1, keepdims=True)
        e = jnp.exp(sim - m)
        denom = jnp.sum(e, axis=-1, keepdims=True)                          # (T, 1)
        gcn_scaled = (gcn_all[:, lo:hi] / denom).astype(jnp.bfloat16)       # (T, C_out)

        out_b = jnp.einsum('st,so->to', e.astype(jnp.bfloat16), gcn_scaled,
                           preferred_element_type=jnp.float32)              # (T, C_out)
        out_b = out_b + dis_part[:, lo:hi]

        # LIF single step, thresholds folded: spike = (out >= (v_th - v_reset)*tau).
        # Stored inside the loop to bound live ranges (no list + concatenate).
        o_ref[:, pl.ds(lo, c_out)] = (out_b >= thr_eff).astype(o_ref.dtype)

    # TODO(synk): for large T, tile the (T,T) sim/e working set along the key axis
    # (flash-style online softmax) to stay inside v7x's 64 MiB VMEM.


def global_spiking_feature(x_tbc, w1, b1, w2, b2,
                           sigma=1.0, tau=2.0, v_threshold=1.0, v_reset=0.0,
                           batch_tile=None, vmem_limit_bytes=None):
    """x_tbc: (T, B, C_in) float32 -> (T, B, C_out) float32 spikes."""
    T, B, C_in = x_tbc.shape
    C_out = int(w1.shape[0])

    bt = B if batch_tile is None else int(batch_tile)
    assert B % bt == 0, "batch_tile must divide B"
    # Mosaic (8,128) rule: the lane dims of the x / output blocks must either equal
    # the full array dim (bt == B) or be multiples of 128.  (Pick bt so bt*C_out is
    # a multiple of 128 to get a >=2-step grid and use both v7x TensorCores.)
    assert bt == B or ((bt * C_in) % 128 == 0 and (bt * C_out) % 128 == 0), (
        "batch_tile must equal B, or bt*C_in and bt*C_out must be multiples of 128")

    # Native layout, no HBM transpose: (T, B, C_in) -> (T, B*C_in) is a free reshape.
    x2d = x_tbc.astype(jnp.float32).reshape(T, B * C_in)

    w1f = w1.astype(jnp.float32)
    b1f = b1.astype(jnp.float32)
    w2f = w2.astype(jnp.float32)
    b2f = b2.astype(jnp.float32)

    # Pre-transposed / pre-fused weights, replicated block-diagonally so one matmul
    # handles all bt batches per path (tiny one-time wrapper cost).
    # TODO(synk): for bt*C_in > 256, switch to a (bt*T, C_in) batched dot instead of
    # block-diag weights (block-diag would start wasting MXU K passes).
    w1t = w1f.T                                    # (C_in, C_out)
    w21t = (w2f @ w1f).T                           # (C_in, C_out) = (W2 @ W1)^T
    b21 = w2f @ b1f + b2f
    eye = jnp.eye(bt, dtype=jnp.float32)
    w1bd = jnp.kron(eye, w1t).astype(jnp.bfloat16)     # (bt*C_in, bt*C_out)
    w21bd = jnp.kron(eye, w21t).astype(jnp.bfloat16)   # (bt*C_in, bt*C_out)
    b1r = jnp.tile(b1f.reshape(1, C_out), (1, bt))     # (1, bt*C_out)
    b21r = jnp.tile(b21.reshape(1, C_out), (1, bt))    # (1, bt*C_out)

    # Batch-independent positional adjacency, hoisted out of the kernel and
    # pre-transposed so the in-kernel propagation is a plain dot; bf16 MXU operand.
    pos = jnp.arange(T, dtype=jnp.float32)
    dis = jnp.exp(-jnp.abs(pos[:, None] - pos[None, :]) / sigma)
    dis_smT = jax.nn.softmax(dis, axis=-1).T.astype(jnp.bfloat16)   # (T, T)

    # LIF: v0 = v_reset (hard reset), H = v_reset + x/tau, spike = H >= v_th.
    vr = 0.0 if v_reset is None else v_reset
    thr_eff = float((v_threshold - vr) * tau)

    kernel = functools.partial(gsf_kernel, bt=bt, c_out=C_out, thr_eff=thr_eff)
    single = pl.Buffered(1)          # grid-invariant inputs: no double buffering

    out_flat = pl.pallas_call(
        kernel,
        out_shape=jax.ShapeDtypeStruct((T, B * C_out), jnp.float32),
        grid=(B // bt,),
        in_specs=[
            pl.BlockSpec((T, bt * C_in), lambda i: (0, i)),                  # x slab
            pl.BlockSpec((bt * C_in, bt * C_out), lambda i: (0, 0),
                         pipeline_mode=single),                              # W1^T (blkdiag)
            pl.BlockSpec((1, bt * C_out), lambda i: (0, 0),
                         pipeline_mode=single),                              # b1
            pl.BlockSpec((bt * C_in, bt * C_out), lambda i: (0, 0),
                         pipeline_mode=single),                              # (W2 W1)^T
            pl.BlockSpec((1, bt * C_out), lambda i: (0, 0),
                         pipeline_mode=single),                              # W2 b1 + b2
            pl.BlockSpec((T, T), lambda i: (0, 0),
                         pipeline_mode=single),                              # softmax(dis)^T
        ],
        out_specs=pl.BlockSpec((T, bt * C_out), lambda i: (0, i)),
        compiler_params=pltpu.CompilerParams(
            dimension_semantics=("parallel",),        # batch tiles independent
            vmem_limit_bytes=vmem_limit_bytes),       # raise on v5e/v6e for large T
    )(x2d, w1bd, b1r, w21bd, b21r, dis_smT)

    # Free reshape (no data movement): (T, B*C_out) -> (T, B, C_out).
    return out_flat.reshape(T, B, C_out)


if __name__ == "__main__":
    # Small shapes consistent with the module: sequence T, batch B, channels.
    T, B, C_IN, C_OUT = 16, 2, 4, 8

    key = jax.random.PRNGKey(0)
    kx, kw1, kb1, kw2, kb2 = jax.random.split(key, 5)

    # Deterministic synthetic parameters (Conv1d kernel_size=1 -> matrices).
    bound1 = 1.0 / jnp.sqrt(C_IN)
    bound2 = 1.0 / jnp.sqrt(C_OUT)
    w1 = jax.random.uniform(kw1, (C_OUT, C_IN), jnp.float32, -bound1, bound1)
    b1 = jax.random.uniform(kb1, (C_OUT,), jnp.float32, -bound1, bound1)
    w2 = jax.random.uniform(kw2, (C_OUT, C_OUT), jnp.float32, -bound2, bound2)
    b2 = jax.random.uniform(kb2, (C_OUT,), jnp.float32, -bound2, bound2)

    x = jax.random.normal(kx, (T, B, C_IN), jnp.float32)

    out = global_spiking_feature(x, w1, b1, w2, b2, sigma=1.0, tau=2.0)
    out = jax.block_until_ready(out)

    assert out.shape == (T, B, C_OUT)
    assert out.dtype == jnp.float32
    print("KERNEL_OK")
</pallas_src>

<mosaic_0001>
module attributes {stable_mosaic.version = 11 : i64} {
  func.func @gsf_kernel(%arg0: i32, %arg1: memref<16x8xf32, #tpu.memory_space<vmem>>, %arg2: memref<8x16xbf16, #tpu.memory_space<vmem>>, %arg3: memref<1x16xf32, #tpu.memory_space<vmem>>, %arg4: memref<8x16xbf16, #tpu.memory_space<vmem>>, %arg5: memref<1x16xf32, #tpu.memory_space<vmem>>, %arg6: memref<16x16xbf16, #tpu.memory_space<vmem>>, %arg7: memref<16x16xf32, #tpu.memory_space<vmem>>) attributes {dimension_semantics = [#tpu.dimension_semantics<parallel>], iteration_bounds = array<i64: 1>, scalar_prefetch = 0 : i64, scratch_operands = 0 : i64, tpu.core_type = #tpu.core_type<tc>, window_params = [{transform_indices = @transform_0, window_bounds = array<i64: 16, 8>}, {pipeline_mode = #tpu.pipeline_mode<synchronous>, transform_indices = @transform_1, window_bounds = array<i64: 8, 16>}, {pipeline_mode = #tpu.pipeline_mode<synchronous>, transform_indices = @transform_2, window_bounds = array<i64: 1, 16>}, {pipeline_mode = #tpu.pipeline_mode<synchronous>, transform_indices = @transform_3, window_bounds = array<i64: 8, 16>}, {pipeline_mode = #tpu.pipeline_mode<synchronous>, transform_indices = @transform_4, window_bounds = array<i64: 1, 16>}, {pipeline_mode = #tpu.pipeline_mode<synchronous>, transform_indices = @transform_5, window_bounds = array<i64: 16, 16>}, {transform_indices = @transform_6, window_bounds = array<i64: 16, 16>}]} {
    %c0 = arith.constant 0 : index
    %c0_0 = arith.constant 0 : index
    %0 = vector.load %arg1[%c0, %c0_0] : memref<16x8xf32, #tpu.memory_space<vmem>>, vector<16x8xf32>
    %1 = arith.truncf %0 : vector<16x8xf32> to vector<16x8xbf16>
    %c0_1 = arith.constant 0 : index
    %c0_2 = arith.constant 0 : index
    %2 = vector.load %arg2[%c0_1, %c0_2] : memref<8x16xbf16, #tpu.memory_space<vmem>>, vector<8x16xbf16>
    %cst = arith.constant dense<0.000000e+00> : vector<16x16xf32>
    %3 = tpu.matmul %1, %2, %cst {dimension_numbers = #tpu.dot_dimension_numbers<[1], [0], [0], [1], [0, 0, 1, 1], [], []>} : vector<16x8xbf16>, vector<8x16xbf16>, vector<16x16xf32> -> vector<16x16xf32>
    %c0_3 = arith.constant 0 : index
    %c0_4 = arith.constant 0 : index
    %4 = vector.load %arg3[%c0_3, %c0_4] : memref<1x16xf32, #tpu.memory_space<vmem>>, vector<1x16xf32>
    %5 = vector.broadcast %4 : vector<1x16xf32> to vector<16x16xf32>
    %6 = arith.addf %3, %5 : vector<16x16xf32>
    %c0_5 = arith.constant 0 : index
    %c0_6 = arith.constant 0 : index
    %7 = vector.load %arg4[%c0_5, %c0_6] : memref<8x16xbf16, #tpu.memory_space<vmem>>, vector<8x16xbf16>
    %cst_7 = arith.constant dense<0.000000e+00> : vector<16x16xf32>
    %8 = tpu.matmul %1, %7, %cst_7 {dimension_numbers = #tpu.dot_dimension_numbers<[1], [0], [0], [1], [0, 0, 1, 1], [], []>} : vector<16x8xbf16>, vector<8x16xbf16>, vector<16x16xf32> -> vector<16x16xf32>
    %c0_8 = arith.constant 0 : index
    %c0_9 = arith.constant 0 : index
    %9 = vector.load %arg5[%c0_8, %c0_9] : memref<1x16xf32, #tpu.memory_space<vmem>>, vector<1x16xf32>
    %10 = vector.broadcast %9 : vector<1x16xf32> to vector<16x16xf32>
    %11 = arith.addf %8, %10 : vector<16x16xf32>
    %12 = arith.truncf %11 : vector<16x16xf32> to vector<16x16xbf16>
    %c0_10 = arith.constant 0 : index
    %c0_11 = arith.constant 0 : index
    %13 = vector.load %arg6[%c0_10, %c0_11] : memref<16x16xbf16, #tpu.memory_space<vmem>>, vector<16x16xbf16>
    %cst_12 = arith.constant dense<0.000000e+00> : vector<16x16xf32>
    %14 = tpu.matmul %13, %12, %cst_12 {dimension_numbers = #tpu.dot_dimension_numbers<[1], [0], [0], [1], [0, 0, 1, 1], [], []>} : vector<16x16xbf16>, vector<16x16xbf16>, vector<16x16xf32> -> vector<16x16xf32>
    %15 = vector.extract_strided_slice %6 {offsets = [0, 0], sizes = [16, 8], strides = [1, 1]} : vector<16x16xf32> to vector<16x8xf32>
    %16 = arith.mulf %15, %15 : vector<16x8xf32>
    %cst_13 = arith.constant dense<0.000000e+00> : vector<16xf32>
    %17 = vector.multi_reduction <add>, %16, %cst_13 [1] : vector<16x8xf32> to vector<16xf32>
    %18 = vector.shape_cast %17 : vector<16xf32> to vector<16x1xf32>
    %cst_14 = arith.constant 1.000000e-24 : f32
    %19 = vector.broadcast %cst_14 : f32 to vector<16x1xf32>
    %20 = arith.maximumf %18, %19 : vector<16x1xf32>
    %21 = math.rsqrt %20 : vector<16x1xf32>
    %22 = vector.broadcast %21 : vector<16x1xf32> to vector<16x8xf32>
    %23 = arith.mulf %15, %22 : vector<16x8xf32>
    %24 = arith.truncf %23 : vector<16x8xf32> to vector<16x8xbf16>
    "tpu.trace_start"() <{level = 10 : i32, message = "tc,sc->ts"}> : () -> ()
    %cst_15 = arith.constant dense<0.000000e+00> : vector<16x16xf32>
    %25 = tpu.matmul %24, %24, %cst_15 {dimension_numbers = #tpu.dot_dimension_numbers<[1], [1], [0], [0], [0, 0, 1, 0], [], []>} : vector<16x8xbf16>, vector<16x8xbf16>, vector<16x16xf32> -> vector<16x16xf32>
    "tpu.trace_stop"() : () -> ()
    %cst_16 = arith.constant dense<0xFF800000> : vector<16xf32>
    %26 = vector.multi_reduction <maximumf>, %25, %cst_16 [1] : vector<16x16xf32> to vector<16xf32>
    %27 = vector.shape_cast %26 : vector<16xf32> to vector<16x1xf32>
    %28 = vector.broadcast %27 : vector<16x1xf32> to vector<16x16xf32>
    %29 = arith.subf %25, %28 : vector<16x16xf32>
    %30 = math.exp %29 : vector<16x16xf32>
    %cst_17 = arith.constant dense<0.000000e+00> : vector<16xf32>
    %31 = vector.multi_reduction <add>, %30, %cst_17 [1] : vector<16x16xf32> to vector<16xf32>
    %32 = vector.shape_cast %31 : vector<16xf32> to vector<16x1xf32>
    %33 = vector.extract_strided_slice %11 {offsets = [0, 0], sizes = [16, 8], strides = [1, 1]} : vector<16x16xf32> to vector<16x8xf32>
    %34 = vector.broadcast %32 : vector<16x1xf32> to vector<16x8xf32>
    %35 = arith.divf %33, %34 : vector<16x8xf32>
    %36 = arith.truncf %35 : vector<16x8xf32> to vector<16x8xbf16>
    %37 = arith.truncf %30 : vector<16x16xf32> to vector<16x16xbf16>
    "tpu.trace_start"() <{level = 10 : i32, message = "st,so->to"}> : () -> ()
    %cst_18 = arith.constant dense<0.000000e+00> : vector<16x8xf32>
    %38 = tpu.matmul %37, %36, %cst_18 {dimension_numbers = #tpu.dot_dimension_numbers<[0], [0], [1], [1], [0, 1, 1, 1], [], []>} : vector<16x16xbf16>, vector<16x8xbf16>, vector<16x8xf32> -> vector<16x8xf32>
    "tpu.trace_stop"() : () -> ()
    %39 = vector.extract_strided_slice %14 {offsets = [0, 0], sizes = [16, 8], strides = [1, 1]} : vector<16x16xf32> to vector<16x8xf32>
    %40 = arith.addf %38, %39 : vector<16x8xf32>
    %cst_19 = arith.constant 2.000000e+00 : f32
    %41 = vector.broadcast %cst_19 : f32 to vector<16x8xf32>
    %42 = arith.cmpf oge, %40, %41 : vector<16x8xf32>
    %43 = arith.extui %42 : vector<16x8xi1> to vector<16x8xi32>
    %44 = arith.sitofp %43 : vector<16x8xi32> to vector<16x8xf32>
    %c0_20 = arith.constant 0 : index
    %c0_21 = arith.constant 0 : index
    %45 = vector.load %arg7[%c0_20, %c0_21] : memref<16x16xf32, #tpu.memory_space<vmem>>, vector<16x8xf32>
    tpu.vector_store %arg7[%c0_20, %c0_21], %44 {strides = array<i32>} : memref<16x16xf32, #tpu.memory_space<vmem>>, vector<16x8xf32>,
    %46 = vector.extract_strided_slice %6 {offsets = [0, 8], sizes = [16, 8], strides = [1, 1]} : vector<16x16xf32> to vector<16x8xf32>
    %47 = arith.mulf %46, %46 : vector<16x8xf32>
    %cst_22 = arith.constant dense<0.000000e+00> : vector<16xf32>
    %48 = vector.multi_reduction <add>, %47, %cst_22 [1] : vector<16x8xf32> to vector<16xf32>
    %49 = vector.shape_cast %48 : vector<16xf32> to vector<16x1xf32>
    %cst_23 = arith.constant 1.000000e-24 : f32
    %50 = vector.broadcast %cst_23 : f32 to vector<16x1xf32>
    %51 = arith.maximumf %49, %50 : vector<16x1xf32>
    %52 = math.rsqrt %51 : vector<16x1xf32>
    %53 = vector.broadcast %52 : vector<16x1xf32> to vector<16x8xf32>
    %54 = arith.mulf %46, %53 : vector<16x8xf32>
    %55 = arith.truncf %54 : vector<16x8xf32> to vector<16x8xbf16>
    "tpu.trace_start"() <{level = 10 : i32, message = "tc,sc->ts"}> : () -> ()
    %cst_24 = arith.constant dense<0.000000e+00> : vector<16x16xf32>
    %56 = tpu.matmul %55, %55, %cst_24 {dimension_numbers = #tpu.dot_dimension_numbers<[1], [1], [0], [0], [0, 0, 1, 0], [], []>} : vector<16x8xbf16>, vector<16x8xbf16>, vector<16x16xf32> -> vector<16x16xf32>
    "tpu.trace_stop"() : () -> ()
    %cst_25 = arith.constant dense<0xFF800000> : vector<16xf32>
    %57 = vector.multi_reduction <maximumf>, %56, %cst_25 [1] : vector<16x16xf32> to vector<16xf32>
    %58 = vector.shape_cast %57 : vector<16xf32> to vector<16x1xf32>
    %59 = vector.broadcast %58 : vector<16x1xf32> to vector<16x16xf32>
    %60 = arith.subf %56, %59 : vector<16x16xf32>
    %61 = math.exp %60 : vector<16x16xf32>
    %cst_26 = arith.constant dense<0.000000e+00> : vector<16xf32>
    %62 = vector.multi_reduction <add>, %61, %cst_26 [1] : vector<16x16xf32> to vector<16xf32>
    %63 = vector.shape_cast %62 : vector<16xf32> to vector<16x1xf32>
    %64 = vector.extract_strided_slice %11 {offsets = [0, 8], sizes = [16, 8], strides = [1, 1]} : vector<16x16xf32> to vector<16x8xf32>
    %65 = vector.broadcast %63 : vector<16x1xf32> to vector<16x8xf32>
    %66 = arith.divf %64, %65 : vector<16x8xf32>
    %67 = arith.truncf %66 : vector<16x8xf32> to vector<16x8xbf16>
    %68 = arith.truncf %61 : vector<16x16xf32> to vector<16x16xbf16>
    "tpu.trace_start"() <{level = 10 : i32, message = "st,so->to"}> : () -> ()
    %cst_27 = arith.constant dense<0.000000e+00> : vector<16x8xf32>
    %69 = tpu.matmul %68, %67, %cst_27 {dimension_numbers = #tpu.dot_dimension_numbers<[0], [0], [1], [1], [0, 1, 1, 1], [], []>} : vector<16x16xbf16>, vector<16x8xbf16>, vector<16x8xf32> -> vector<16x8xf32>
    "tpu.trace_stop"() : () -> ()
    %70 = vector.extract_strided_slice %14 {offsets = [0, 8], sizes = [16, 8], strides = [1, 1]} : vector<16x16xf32> to vector<16x8xf32>
    %71 = arith.addf %69, %70 : vector<16x8xf32>
    %cst_28 = arith.constant 2.000000e+00 : f32
    %72 = vector.broadcast %cst_28 : f32 to vector<16x8xf32>
    %73 = arith.cmpf oge, %71, %72 : vector<16x8xf32>
    %74 = arith.extui %73 : vector<16x8xi1> to vector<16x8xi32>
    %75 = arith.sitofp %74 : vector<16x8xi32> to vector<16x8xf32>
    %c0_29 = arith.constant 0 : index
    %c8 = arith.constant 8 : index
    %76 = vector.load %arg7[%c0_29, %c8] : memref<16x16xf32, #tpu.memory_space<vmem>>, vector<16x8xf32>
    tpu.vector_store %arg7[%c0_29, %c8], %75 {strides = array<i32>} : memref<16x16xf32, #tpu.memory_space<vmem>>, vector<16x8xf32>,
    return
  }
  func.func @transform_0(%arg0: i32) -> (i32, i32) {
    %c0_i32 = arith.constant 0 : i32
    %c0_i32_0 = arith.constant 0 : i32
    return %c0_i32, %arg0 : i32, i32
  }
  func.func @transform_1(%arg0: i32) -> (i32, i32) {
    %c0_i32 = arith.constant 0 : i32
    %c0_i32_0 = arith.constant 0 : i32
    %c0_i32_1 = arith.constant 0 : i32
    return %c0_i32, %c0_i32_0 : i32, i32
  }
  func.func @transform_2(%arg0: i32) -> (i32, i32) {
    %c0_i32 = arith.constant 0 : i32
    %c0_i32_0 = arith.constant 0 : i32
    %c0_i32_1 = arith.constant 0 : i32
    return %c0_i32, %c0_i32_0 : i32, i32
  }
  func.func @transform_3(%arg0: i32) -> (i32, i32) {
    %c0_i32 = arith.constant 0 : i32
    %c0_i32_0 = arith.constant 0 : i32
    %c0_i32_1 = arith.constant 0 : i32
    return %c0_i32, %c0_i32_0 : i32, i32
  }
  func.func @transform_4(%arg0: i32) -> (i32, i32) {
    %c0_i32 = arith.constant 0 : i32
    %c0_i32_0 = arith.constant 0 : i32
    %c0_i32_1 = arith.constant 0 : i32
    return %c0_i32, %c0_i32_0 : i32, i32
  }
  func.func @transform_5(%arg0: i32) -> (i32, i32) {
    %c0_i32 = arith.constant 0 : i32
    %c0_i32_0 = arith.constant 0 : i32
    %c0_i32_1 = arith.constant 0 : i32
    return %c0_i32, %c0_i32_0 : i32, i32
  }
  func.func @transform_6(%arg0: i32) -> (i32, i32) {
    %c0_i32 = arith.constant 0 : i32
    %c0_i32_0 = arith.constant 0 : i32
    return %c0_i32, %arg0 : i32, i32
  }
}

</mosaic_0001>

<bundles_post_ra>
// kernel: tpu_custom_call.1
= control target key start
LH: loop header
LB: loop body
LE: loop exit
PB: predicated region body
PF: predicated region fallthrough
CT: control target
= control target key end

     0   :  { %vm37_vm0 = vcmask 1043456   ;;  %vm33_vm1 = vcmask 64512   ;;  %s639_s0 = inlined_call_operand.vmem [shape: f32[16,8], index: 0, kind: input, shape index: {}]   ;;  %s640_s1 = inlined_call_operand.vmem [shape: bf16[8,16], index: 1, kind: input, shape index: {}]   ;;  %s641_s2 = inlined_call_operand.vmem [shape: f32[1,16], index: 2, kind: input, shape index: {}]   ;;  %s642_s3 = inlined_call_operand.vmem [shape: bf16[8,16], index: 3, kind: input, shape index: {}]   ;;  %s643_s4 = inlined_call_operand.vmem [shape: f32[1,16], index: 4, kind: input, shape index: {}]   ;;  %s644_s5 = inlined_call_operand.vmem [shape: bf16[16,16], index: 5, kind: input, shape index: {}]   ;;  %s645_s6 = inlined_call_operand.hbm [shape: f32[16,16], index: 6, kind: output, shape index: {}]  }
   0x1   :  { %v28_v0 = vld [vmem:[%s640_s1] sm:$0xf]  ;;  %v26_v2 = vld [vmem:[%s639_s0 + $0x8] sm:$0xff] }
   0x2   :  { %v25_v1 = vld [vmem:[%s639_s0] sm:$0xff]  ;;  %v39_v3 = vsel %vm37_vm0, %v28_v0, 0 }
   0x3   :  { %v27_v4 = vpack.c.bf16 %v26_v2, %v25_v1  ;;  %48 = vmatpush.bf16.msra.mxu0 %v39_v3 }
   0x4   :  { %11 = vsyncpa [#allocation3], 0  ;;  %v460_v5 = vld [vmem:[%s641_s2] ss:$0 sm:$0xff]  ;;  %s512_s1 = smov 120   ;;  %vm85_vm14 = vcmask 130048  }
   0x5   :  { %v55_v38 = vld [vmem:[%s642_s3] sm:$0xf]  ;;  %s515_s7 = smov [#allocation2]   ;;  %s421_s11 = sshll.u32 %s645_s6, 4  ;;  %s422_s11 = int_to_ptr.hbm [resolvable:$true] %s421_s11 }
   0x6   :  { %433 = vmatmul.msk.bf16.vlgmr.msra.gmra.mxu0 %vm33_vm1, %v27_v4  ;;  %v61_v39 = vsel %vm37_vm0, %v55_v38, 0  ;;  %v461_v51 = vld [vmem:[%s643_s4] ss:$0 sm:$0xff]  ;;  %s419_s8 = sshll.u32 %s515_s7, 4  ;;  %s516_s12 = smov 128   ;;  %s420_s8 = int_to_ptr.vmem [resolvable:$true] %s419_s8 }
   0x7   :  { %70 = vmatpush.bf16.msra.mxu1 %v61_v39 }
   0xa   :  { %434 = vmatmul.msk.bf16.vlgmr.msra.gmra.mxu1 %vm33_vm1, %v27_v4 }
  0x83   :  { %v50_v6 = vpop.f32.mrf.mxu0 }
  0x84   :  { %v566_v7 = vadd.f32 %v460_v5, %v50_v6 }
  0x86   :  { %v103_v8 = vmul.f32 %v566_v7, %v566_v7 }
  0x87   :  { %v72_v49 = vpop.f32.mrf.mxu1 }
  0x88   :  { %246 = vrot.lane.b32.xlu0 %v103_v8, %s512_s1  ;;  %v105_v40 = vsel %vm33_vm1, %v103_v8, 0.0  ;;  %v593_v53 = vadd.f32 %v461_v51, %v72_v49 }
  0x8b   :  { %v52_v9 = vpop.f32.mrf.mxu0 }
  0x8c   :  { %v571_v10 = vadd.f32 %v460_v5, %v52_v9 }
  0x8e   :  { %v104_v11 = vmul.f32 %v571_v10, %v571_v10 }
  0x8f   :  { %v74_v55 = vpop.f32.mrf.mxu1 }
  0x90   :  { %248 = vrot.lane.b32.xlu0 %v104_v11, %s512_s1  ;;  %v108_v12 = vsel %vm33_vm1, %v104_v11, 0.0  ;;  %v595_v58 = vadd.f32 %v461_v51, %v74_v55 }
  0x92   :  { %v77_v60 = vpack.c.bf16 %v595_v58, %v593_v53 }
  0x94   :  { %96 = vmatpush.bf16.msra.mxu2 %v77_v60 }
  0xba   :  { %109 = vadd.xlane.f32.xlu0 %v108_v12 }
  0xfa   :  { %v247_v13 = vpop.permute.xlu0 %246 }
  0xfb   :  { %v252_v14 = vsel %vm33_vm1, %v247_v13, 0.0 }
  0xfc   :  { %253 = vadd.xlane.f32.xlu1 %v252_v14 }
 0x102   :  { %v249_v15 = vpop.permute.xlu0 %248 }
 0x103   :  { %v255_v16 = vsel %vm33_vm1, %v249_v15, 0.0 }
 0x104   :  { %256 = vadd.xlane.f32.xlu1 %v255_v16 }
 0x12d   :  { %v110_v43 = vpop.xlane.xlu0 %109 }
 0x12e   :  { %v112_v44 = vmax.f32 %v110_v43, 1e-24 }
 0x130   :  { %vm129_vm9 = vweird.f32 %v112_v44 }
 0x16f   :  { %v254_v17 = vpop.xlane.xlu1 %253 }
 0x170   :  { %v258_v18 = vmax.f32 %v254_v17, 1e-24 }
 0x172   :  { %462 = vrsqrt.f32 %v258_v18  ;;  %vm266_vm3 = vweird.f32 %v258_v18 }
 0x177   :  { %v257_v19 = vpop.xlane.xlu1 %256 }
 0x178   :  { %v463_v20 = vpop.eup %462  ;;  %v259_v21 = vmax.f32 %v257_v19, 1e-24 }
 0x179   :  { %v261_v22 = vmul.f32 %v463_v20, %v258_v18  ;;  %vm267_vm2 = vweird.f32 %v463_v20 }
 0x17a   :  { %464 = vrsqrt.f32 %v259_v21  ;;  %vm268_vm5 = vmor %vm266_vm3, %vm267_vm2  ;;  %vm276_vm6 = vweird.f32 %v259_v21 }
 0x17b   :  { %v262_v23 = vmul.f32 %v463_v20, %v261_v22  ;;  %466 = vrsqrt.f32 %v112_v44 }
 0x17d   :  { %v263_v24 = vmul.f32 0.5, %v262_v23 }
 0x17f   :  { %v264_v26 = vsub.f32 1.5, %v263_v24 }
 0x180   :  { %v465_v25 = vpop.eup %464 }
 0x181   :  { %v271_v27 = vmul.f32 %v465_v25, %v259_v21  ;;  %v265_v30 = vmul.f32 %v463_v20, %v264_v26  ;;  %vm277_vm4 = vweird.f32 %v465_v25  ;;  %v467_v45 = vpop.eup %466  ;;  %v448_v26 = vld [vmem:[%s644_s5] sm:$0xff]  ;;  %s514_s5 = smov 8  }
 0x182   :  { %vm278_vm7 = vmor %vm276_vm6, %vm277_vm4  ;;  %v124_v46 = vmul.f32 %v467_v45, %v112_v44  ;;  %vm130_vm8 = vweird.f32 %v467_v45  ;;  %439 = vmatmul.msk.bf16.vlgmr.msra.gmra.mxu2 %vm85_vm14, %v448_v26 }
 0x183   :  { %v272_v28 = vmul.f32 %v465_v25, %v271_v27  ;;  %v269_v32 = vsel %vm268_vm5, %v463_v20, %v265_v30  ;;  %vm131_vm11 = vmor %vm129_vm9, %vm130_vm8 }
 0x184   :  { %v280_v35 = vmul.f32 %v269_v32, %v566_v7  ;;  %v125_v50 = vmul.f32 %v467_v45, %v124_v46 }
 0x185   :  { %v273_v29 = vmul.f32 0.5, %v272_v28 }
 0x186   :  { %v126_v52 = vmul.f32 0.5, %v125_v50 }
 0x187   :  { %v274_v31 = vsub.f32 1.5, %v273_v29 }
 0x188   :  { %v127_v56 = vsub.f32 1.5, %v126_v52 }
 0x189   :  { %v275_v33 = vmul.f32 %v465_v25, %v274_v31 }
 0x18a   :  { %v128_v62 = vmul.f32 %v467_v45, %v127_v56 }
 0x18b   :  { %v279_v34 = vsel %vm278_vm7, %v465_v25, %v275_v33 }
 0x18c   :  { %v281_v36 = vmul.f32 %v279_v34, %v571_v10  ;;  %v132_v1 = vsel %vm131_vm11, %v467_v45, %v128_v62 }
 0x18d   :  { %v134_v4 = vmul.f32 %v132_v1, %v571_v10 }
 0x18e   :  { %v282_v37 = vpack.c.bf16 %v281_v36, %v280_v35 }
 0x190   :  { %284 = vrot.lane.b32.xlu2 %v282_v37, %s512_s1 }
 0x1b9   :  { %106 = vadd.xlane.f32.xlu2 %v105_v40 }
 0x1ea   :  { %v285_v41 = vpop.permute.xlu2 %284 }
 0x1eb   :  { %v287_v42 = vsel %vm33_vm1, %v285_v41, 0 }
 0x1ec   :  { %296 = vmatpush.bf16.xpose.msrb.mxu1 %v287_v42 }
 0x1f3   :  { %444 = vmatmul.msk.bf16.vlgmr.msrb.gmra.mxu1 %vm33_vm1, %v285_v41 }
 0x22c   :  { %v107_v47 = vpop.xlane.xlu2 %106 }
 0x22d   :  { %v111_v48 = vmax.f32 %v107_v47, 1e-24 }
 0x22f   :  { %468 = vrsqrt.f32 %v111_v48  ;;  %vm119_vm12 = vweird.f32 %v111_v48 }
 0x235   :  { %v469_v54 = vpop.eup %468 }
 0x236   :  { %v114_v57 = vmul.f32 %v469_v54, %v111_v48  ;;  %vm120_vm10 = vweird.f32 %v469_v54 }
 0x237   :  { %vm121_vm13 = vmor %vm119_vm12, %vm120_vm10 }
 0x238   :  { %v115_v59 = vmul.f32 %v469_v54, %v114_v57 }
 0x23a   :  { %v116_v61 = vmul.f32 0.5, %v115_v59 }
 0x23c   :  { %v117_v63 = vsub.f32 1.5, %v116_v61 }
 0x23e   :  { %v118_v0 = vmul.f32 %v469_v54, %v117_v63 }
 0x240   :  { %v122_v2 = vsel %vm121_vm13, %v469_v54, %v118_v0 }
 0x241   :  { %v133_v3 = vmul.f32 %v122_v2, %v566_v7  ;;  %v98_v2 = vpop.f32.mrf.mxu2 }
 0x243   :  { %v135_v5 = vpack.c.bf16 %v134_v4, %v133_v3 }
 0x245   :  { %v137_v6 = vsel %vm33_vm1, %v135_v5, 0 }
 0x246   :  { %146 = vmatpush.bf16.xpose.msra.mxu3 %v137_v6 }
 0x249   :  { %v625_v3 = vpop.f32.mrf.mxu2 }
 0x24d   :  { %440 = vmatmul.msk.bf16.vlgmr.msra.gmra.mxu3 %vm33_vm1, %v135_v5 }
 0x270   :  { %v298_v8 = vpop.f32.mrf.mxu1 }
 0x271   :  { %v303_v9 = vsel %vm85_vm14, %v298_v8, -inf }
 0x272   :  { %304 = vmax.xlane.f32.xlu1 %v303_v9 }
 0x278   :  { %v300_v11 = vpop.f32.mrf.mxu1 }
 0x279   :  { %v306_v12 = vsel %vm85_vm14, %v300_v11, -inf }
 0x27a   :  { %307 = vmax.xlane.f32.xlu1 %v306_v12 }
 0x2d0   :  { %v148_v13 = vpop.f32.mrf.mxu3 }
 0x2d1   :  { %v153_v24 = vsel %vm85_vm14, %v148_v13, -inf }
 0x2d8   :  { %v150_v14 = vpop.f32.mrf.mxu3 }
 0x2d9   :  { %v156_v7 = vsel %vm85_vm14, %v150_v14, -inf }
 0x2da   :  { %157 = vmax.xlane.f32.xlu2 %v156_v7 }
 0x2e5   :  { %v305_v10 = vpop.xlane.xlu1 %304 }
 0x2e6   :  { %v309_v15 = vsub.f32 %v298_v8, %v305_v10 }
 0x2e8   :  { %v311_v16 = vmul.f32 1.442695, %v309_v15 }
 0x2ea   :  { %470 = vpow2.f32 %v311_v16 }
 0x2ed   :  { %v308_v17 = vpop.xlane.xlu1 %307 }
 0x2ee   :  { %v310_v18 = vsub.f32 %v300_v11, %v308_v17 }
 0x2f0   :  { %v471_v19 = vpop.eup %470  ;;  %v313_v20 = vmul.f32 1.442695, %v310_v18 }
 0x2f1   :  { %v315_v21 = vsel %vm85_vm14, %v471_v19, 0.0 }
 0x2f2   :  { %472 = vpow2.f32 %v313_v20  ;;  %316 = vadd.xlane.f32.xlu1 %v315_v21 }
 0x2f8   :  { %v473_v22 = vpop.eup %472 }
 0x2f9   :  { %v318_v23 = vsel %vm85_vm14, %v473_v22, 0.0  ;;  %v352_v25 = vpack.c.bf16 %v473_v22, %v471_v19 }
 0x2fa   :  { %319 = vadd.xlane.f32.xlu1 %v318_v23 }
 0x302   :  { %154 = vmax.xlane.f32.xlu1 %v153_v24 }
 0x303   :  { %353 = vxpose.xlu2.c.b16.start.end [1/1] (short) (narrow) %v352_v25, 16 }
 0x34d   :  { %v158_v34 = vpop.xlane.xlu2 %157 }
 0x34e   :  { %v160_v42 = vsub.f32 %v150_v14, %v158_v34 }
 0x350   :  { %v163_v51 = vmul.f32 1.442695, %v160_v42 }
 0x365   :  { %v317_v27 = vpop.xlane.xlu1 %316 }
 0x366   :  { %474 = vrcp.f32 %v317_v27  ;;  %v332_v38 = vand.u32 2147483648, %v317_v27  ;;  %vm326_vm0 = vweird.f32 %v317_v27  ;;  %v330_v40 = vand.u32 2147483647, %v317_v27 }
 0x368   :  { %v333_v49 = vor.u32 1.1754944e-38, %v332_v38  ;;  %vm331_vm4 = vcmp.eq.f32.partialorder %v330_v40, 8.507059e+37  ;;  %v513_v38 = vmov 0.0  }
 0x36c   :  { %v475_v28 = vpop.eup %474 }
 0x36d   :  { %v322_v29 = vmul.f32 %v475_v28, %v317_v27  ;;  %v320_v30 = vpop.xlane.xlu1 %319  ;;  %vm327_vm15 = vweird.f32 %v475_v28 }
 0x36e   :  { %476 = vrcp.f32 %v320_v30  ;;  %vm613_vm2 = vmor %vm326_vm0, %vm327_vm15  ;;  %v347_v44 = vand.u32 2147483648, %v320_v30  ;;  %v345_v47 = vand.u32 2147483647, %v320_v30  ;;  %vm341_vm5 = vweird.f32 %v320_v30 }
 0x36f   :  { %v323_v31 = vsub.f32 1.0, %v322_v29 }
 0x370   :  { %v348_v52 = vor.u32 1.1754944e-38, %v347_v44  ;;  %vm346_vm7 = vcmp.eq.f32.partialorder %v345_v47, 8.507059e+37 }
 0x371   :  { %v324_v32 = vmul.f32 %v475_v28, %v323_v31 }
 0x373   :  { %v325_v35 = vadd.f32 %v475_v28, %v324_v32 }
 0x374   :  { %v477_v33 = vpop.eup %476 }
 0x375   :  { %v337_v36 = vmul.f32 %v477_v33, %v320_v30  ;;  %v155_v37 = vpop.xlane.xlu1 %154  ;;  %vm342_vm3 = vweird.f32 %v477_v33  ;;  %v329_v48 = vsel %vm613_vm2, %v475_v28, %v325_v35 }
 0x376   :  { %v159_v39 = vsub.f32 %v148_v13, %v155_v37  ;;  %vm343_vm6 = vmor %vm341_vm5, %vm342_vm3  ;;  %v334_v54 = vsel %vm331_vm4, %v333_v49, %v329_v48  ;;  %vm412_vm5 = vcmask 130112  }
 0x377   :  { %v338_v41 = vsub.f32 1.0, %v337_v36  ;;  %v335_v57 = vmul.f32 %v334_v54, %v593_v53 }
 0x378   :  { %v161_v45 = vmul.f32 1.442695, %v159_v39 }
 0x379   :  { %v339_v46 = vmul.f32 %v477_v33, %v338_v41 }
 0x37a   :  { %478 = vpow2.f32 %v161_v45 }
 0x37b   :  { %v340_v50 = vadd.f32 %v477_v33, %v339_v46  ;;  %480 = vpow2.f32 %v163_v51 }
 0x37d   :  { %v344_v55 = vsel %vm343_vm6, %v477_v33, %v340_v50 }
 0x37e   :  { %v349_v56 = vsel %vm346_vm7, %v348_v52, %v344_v55 }
 0x37f   :  { %v350_v59 = vmul.f32 %v349_v56, %v595_v58 }
 0x380   :  { %v479_v60 = vpop.eup %478 }
 0x381   :  { %v165_v61 = vsel %vm85_vm14, %v479_v60, 0.0  ;;  %v351_v62 = vpack.c.bf16 %v350_v59, %v335_v57  ;;  %v481_v63 = vpop.eup %480 }
 0x382   :  { %166 = vadd.xlane.f32.xlu0 %v165_v61  ;;  %v168_v0 = vsel %vm85_vm14, %v481_v63, 0.0  ;;  %v202_v1 = vpack.c.bf16 %v481_v63, %v479_v60 }
 0x383   :  { %370 = vrot.lane.b32.xlu1 %v351_v62, %s512_s1 }
 0x38a   :  { %169 = vadd.xlane.f32.xlu0 %v168_v0 }
 0x38b   :  { %375 = vrot.lane.b32.xlu1 %v98_v2, %s512_s1 }
 0x393   :  { %377 = vrot.lane.b32.xlu1 %v625_v3, %s512_s1 }
 0x3a4   :  { %v361_v6 = vpop.trf.xlu2 }
 0x3b3   :  { %203 = vxpose.xlu0.c.b16.start.end [1/1] (short) (narrow) %v202_v1, 16 }
 0x3f5   :  { %v167_v4 = vpop.xlane.xlu0 %166  ;;  %v371_v5 = vpop.permute.xlu1 %370 }
 0x3f6   :  { %482 = vrcp.f32 %v167_v4  ;;  %391 = vmatpush.bf16.msrb.mxu2 %v371_v5  ;;  %v182_v15 = vand.u32 2147483648, %v167_v4  ;;  %vm176_vm9 = vweird.f32 %v167_v4  ;;  %v180_v17 = vand.u32 2147483647, %v167_v4 }
 0x3f8   :  { %v183_v22 = vor.u32 1.1754944e-38, %v182_v15  ;;  %vm181_vm13 = vcmp.eq.f32.partialorder %v180_v17, 8.507059e+37 }
 0x3f9   :  { %445 = vmatmul.msk.bf16.vlgmr.msrb.gmra.mxu2 %vm85_vm14, %v361_v6 }
 0x3fc   :  { %v483_v8 = vpop.eup %482 }
 0x3fd   :  { %v172_v9 = vmul.f32 %v483_v8, %v167_v4  ;;  %v170_v11 = vpop.xlane.xlu0 %169  ;;  %vm177_vm8 = vweird.f32 %v483_v8  ;;  %v376_v32 = vpop.permute.xlu1 %375 }
 0x3fe   :  { %484 = vrcp.f32 %v170_v11  ;;  %v197_v18 = vand.u32 2147483648, %v170_v11  ;;  %vm178_vm10 = vmor %vm176_vm9, %vm177_vm8  ;;  %v195_v21 = vand.u32 2147483647, %v170_v11  ;;  %vm191_vm12 = vweird.f32 %v170_v11 }
 0x3ff   :  { %v173_v12 = vsub.f32 1.0, %v172_v9 }
 0x400   :  { %v198_v25 = vor.u32 1.1754944e-38, %v197_v18  ;;  %vm196_vm0 = vcmp.eq.f32.partialorder %v195_v21, 8.507059e+37 }
 0x401   :  { %v174_v13 = vmul.f32 %v483_v8, %v173_v12 }
 0x403   :  { %v175_v10 = vadd.f32 %v483_v8, %v174_v13 }
 0x404   :  { %v485_v14 = vpop.eup %484 }
 0x405   :  { %v187_v7 = vmul.f32 %v485_v14, %v170_v11  ;;  %v179_v20 = vsel %vm178_vm10, %v483_v8, %v175_v10  ;;  %vm192_vm11 = vweird.f32 %v485_v14  ;;  %v378_v35 = vpop.permute.xlu1 %377 }
 0x406   :  { %v184_v24 = vsel %vm181_vm13, %v183_v22, %v179_v20  ;;  %vm193_vm15 = vmor %vm191_vm12, %vm192_vm11 }
 0x407   :  { %v188_v16 = vsub.f32 1.0, %v187_v7  ;;  %v185_v28 = vmul.f32 %v184_v24, %v593_v53 }
 0x409   :  { %v189_v19 = vmul.f32 %v485_v14, %v188_v16 }
 0x40b   :  { %v190_v23 = vadd.f32 %v485_v14, %v189_v19 }
 0x40d   :  { %v194_v26 = vsel %vm193_vm15, %v485_v14, %v190_v23 }
 0x40e   :  { %v199_v27 = vsel %vm196_vm0, %v198_v25, %v194_v26 }
 0x40f   :  { %v200_v29 = vmul.f32 %v199_v27, %v595_v58 }
 0x411   :  { %v201_v30 = vpack.c.bf16 %v200_v29, %v185_v28 }
 0x413   :  { %229 = vmatpush.bf16.msrb.mxu0 %v201_v30 }
 0x45f   :  { %v211_v31 = vpop.trf.xlu0 }
 0x460   :  { %441 = vmatmul.msk.bf16.vlgmr.msrb.gmra.mxu0 %vm85_vm14, %v211_v31 }
 0x47c   :  { %v393_v33 = vpop.f32.mrf.mxu2 }
 0x47d   :  { %v394_v34 = vadd.f32 %v393_v33, %v376_v32 }
 0x47f   :  { %vm398_vm2 = vcmp.ge.f32.partialorder %v394_v34, 2.0 }
 0x480   :  { %v446_v39 = vsel %vm398_vm2, 1.0, %v513_v38 }
 0x484   :  { %v395_v36 = vpop.f32.mrf.mxu2 }
 0x485   :  { %v396_v37 = vadd.f32 %v395_v36, %v378_v35 }
 0x487   :  { %vm399_vm3 = vcmp.ge.f32.partialorder %v396_v37, 2.0 }
 0x488   :  { %v447_v40 = vsel %vm399_vm3, 1.0, %v513_v38 }
 0x489   :  { %v455_v41 = vpack.i.bf16 %v447_v40, %v446_v39 }
 0x48b   :  { %456 = vrot.lane.b32.xlu1 %v455_v41, %s514_s5 }
 0x4dd   :  { %v231_v53 = vpop.f32.mrf.mxu0 }
 0x4de   :  { %v232_v58 = vadd.f32 %v231_v53, %v98_v2 }
 0x4e0   :  { %vm236_vm4 = vcmp.ge.f32.partialorder %v232_v58, 2.0 }
 0x4e1   :  { %v442_v42 = vsel %vm236_vm4, 1.0, %v513_v38 }
 0x4e2   :  { %242 = vst.msk [vmem:[#allocation2] sm:$0xff] %vm33_vm1, %v442_v42 }
 0x4e5   :  { %v233_v43 = vpop.f32.mrf.mxu0 }
 0x4e6   :  { %v234_v44 = vadd.f32 %v233_v43, %v625_v3 }
 0x4e8   :  { %vm237_vm14 = vcmp.ge.f32.partialorder %v234_v44, 2.0 }
 0x4e9   :  { %v443_v45 = vsel %vm237_vm14, 1.0, %v513_v38 }
 0x4ea   :  { %243 = vst.msk [vmem:[#allocation2 + $0x8] sm:$0xff] %vm33_vm1, %v443_v45 }
 0x4fd   :  { %v457_v46 = vpop.permute.xlu1 %456 }
 0x4fe   :  { %v459_v47 = vunpack.i.h.bf16 %v457_v46  ;;  %v458_v48 = vunpack.i.l.bf16 %v457_v46 }
 0x500   :  { %414 = vst.msk [vmem:[#allocation2 + $0x8] sm:$0xff] %vm412_vm5, %v459_v47 }
 0x501   :  { %413 = vst.msk [vmem:[#allocation2] sm:$0xff] %vm412_vm5, %v458_v48 }
 0x502   :  { %427 = dma.vmem_to_hbm [thread:$0]  %s420_s8, 256, %s422_s11, [#allocation3], %s516_s12, %s516_s12, %s514_s5  }
 0x503   :  { %510 = dma.done.wait [#allocation3], 256  }
 0x504   :  { %511 = vsyncadd [#allocation3], 4294967040 }
 0x505   :  { %432 = vsyncpa [#allocation3], 1 }

</bundles_post_ra>
